<compile_context>
chip_gen: v7x
topology: tpu7x:2x2x1
jax: 0.10.0
libtpu: 0.0.40
codegen_flags: <defaults>
</compile_context>

<pallas_src>
import functools

import jax
import jax.numpy as jnp
from jax import lax
from jax.experimental import pallas as pl
from jax.experimental.pallas import tpu as pltpu

BN_EPS = 1e-5
LANE = 128
NUM_CORES = 2          # v7x megacore; costs at most one extra (masked) tile on v5e/v6e
MAX_TILE_M = 1024
VMEM_LIMIT = 32 * 1024 * 1024


def _round_up(x, m):
    return ((x + m - 1) // m) * m


def _cdiv(a, b):
    return (a + b - 1) // b


# --------------------------------------------------------------------------- #
# Kernels
# --------------------------------------------------------------------------- #
def _mlp_folded(h, wf_refs, bf_refs):
    """Apply finished layers with BN already folded into the weights: relu(h @ Wf + bf)."""
    for wf, bf in zip(wf_refs, bf_refs):
        h = jnp.maximum(
            jnp.dot(h, wf[...], preferred_element_type=jnp.float32) + bf[...], 0.0)
    return h


def _stats_kernel(x_ref, *refs, n_prev, tile_m, tiles_per_core, m_true, need_mask):
    """Accumulate per-feature sum / sum-of-squares of the pre-BN layer-`n_prev` output.

    Grid = (NUM_CORES, tiles_per_core); each core owns a private [1, 2, Dpad]
    accumulator block (resident across the inner "arbitrary" axis).
    """
    wfs = refs[0:n_prev]                       # folded weights of layers 0..n_prev-1
    bfs = refs[n_prev:2 * n_prev]              # folded biases
    wt = refs[2 * n_prev]                      # un-folded weight of layer n_prev (pre-BN)
    b = refs[2 * n_prev + 1]                   # un-folded bias
    stats_ref = refs[2 * n_prev + 2]           # [1, 2, Dpad]: row0 = sum, row1 = sum of squares

    c = pl.program_id(0)
    i = pl.program_id(1)

    @pl.when(i == 0)
    def _init():
        stats_ref[...] = jnp.zeros_like(stats_ref)

    h = x_ref[...].astype(jnp.float32)
    h = _mlp_folded(h, wfs, bfs)
    y = jnp.dot(h, wt[...], preferred_element_type=jnp.float32) + b[...]

    if need_mask:
        # Exclude zero-padded rows (they would otherwise contribute the bias).
        tile = c * tiles_per_core + i
        row = tile * tile_m + lax.broadcasted_iota(jnp.int32, (tile_m, 1), 0)
        y = jnp.where(row < m_true, y, 0.0)

    s1 = jnp.sum(y, axis=0, keepdims=True)
    s2 = jnp.sum(y * y, axis=0, keepdims=True)
    stats_ref[...] += jnp.concatenate([s1, s2], axis=0)[None]


def _final_kernel(x_ref, *refs, n_layers, d_out):
    """Full forward with BN folded into the weights; writes the true (unpadded) features."""
    wfs = refs[0:n_layers]
    bfs = refs[n_layers:2 * n_layers]
    o_ref = refs[2 * n_layers]

    h = _mlp_folded(x_ref[...].astype(jnp.float32), wfs, bfs)
    o_ref[...] = h[:, :d_out].astype(o_ref.dtype)


# --------------------------------------------------------------------------- #
# Host-side wrapper
# --------------------------------------------------------------------------- #
def _prepare_params(params, band_dim):
    """Transpose weights and zero-pad all hidden dims to a multiple of 128 lanes."""
    prep = []
    din, din_pad = band_dim, band_dim          # the raw input (B bands) is not padded
    for (w, b, gamma, beta) in params:
        dout = w.shape[0]
        dout_pad = _round_up(dout, LANE)
        wt = jnp.zeros((din_pad, dout_pad), jnp.float32)
        wt = wt.at[:din, :dout].set(w.T.astype(jnp.float32))
        bp = jnp.zeros((1, dout_pad), jnp.float32).at[0, :dout].set(b.astype(jnp.float32))
        gp = jnp.zeros((1, dout_pad), jnp.float32).at[0, :dout].set(gamma.astype(jnp.float32))
        tp = jnp.zeros((1, dout_pad), jnp.float32).at[0, :dout].set(beta.astype(jnp.float32))
        prep.append(dict(wt=wt, b=bp, gamma=gp, beta=tp, dout=dout, dout_pad=dout_pad))
        din, din_pad = dout, dout_pad
    return prep


@jax.jit
def pixel_encoding_forward(ts, params):
    """ts: [N, S, B] -> [N, S, E]; MLP applied per (pixel, timestep) row."""
    N, S, B = ts.shape
    M = N * S
    x = ts.reshape(M, B).astype(jnp.float32)

    layers = _prepare_params(params, B)
    L = len(layers)

    # Row tiling: large tiles for DMA pipelining; sized so the stats grid
    # (NUM_CORES parallel slices x tiles_per_core) wastes little padding.
    tm = min(MAX_TILE_M, _round_up(_cdiv(M, NUM_CORES), 8))
    m_pad = _round_up(M, NUM_CORES * tm)
    tiles_per_core = m_pad // (NUM_CORES * tm)
    need_mask = (m_pad != M)
    if need_mask:
        x = jnp.pad(x, ((0, m_pad - M), (0, 0)))

    # ---- specs -------------------------------------------------------------
    x_spec_stats = pl.BlockSpec((tm, B), lambda c, i: (c * tiles_per_core + i, 0))
    x_spec_final = pl.BlockSpec((tm, B), lambda i: (i, 0))

    def const2(arr):   # whole array resident in VMEM, 2-D stats grid
        return pl.BlockSpec(arr.shape, lambda c, i: (0, 0))

    def const1(arr):   # whole array resident in VMEM, 1-D final grid
        return pl.BlockSpec(arr.shape, lambda i: (0, 0))

    # ---- L stats passes; fold BN into the weights after each one -----------
    wfs, bfs = [], []
    for k, lay in enumerate(layers):
        in_specs = [x_spec_stats]
        args = [x]
        for j in range(k):
            in_specs.append(const2(wfs[j])); args.append(wfs[j])
        for j in range(k):
            in_specs.append(const2(bfs[j])); args.append(bfs[j])
        in_specs.append(const2(lay["wt"])); args.append(lay["wt"])
        in_specs.append(const2(lay["b"])); args.append(lay["b"])

        dpk = lay["dout_pad"]
        stats = pl.pallas_call(
            functools.partial(_stats_kernel, n_prev=k, tile_m=tm,
                              tiles_per_core=tiles_per_core,
                              m_true=M, need_mask=need_mask),
            out_shape=jax.ShapeDtypeStruct((NUM_CORES, 2, dpk), jnp.float32),
            grid=(NUM_CORES, tiles_per_core),
            in_specs=in_specs,
            out_specs=pl.BlockSpec((1, 2, dpk), lambda c, i: (c, 0, 0)),
            compiler_params=pltpu.CompilerParams(
                dimension_semantics=("parallel", "arbitrary"),
                vmem_limit_bytes=VMEM_LIMIT),
        )(*args)

        stats = jnp.sum(stats, axis=0)                   # combine per-core partials
        mean = stats[0:1] / float(M)                     # divide by the TRUE M
        var = jnp.maximum(stats[1:2] / float(M) - mean * mean, 0.0)
        scale = lay["gamma"] * lax.rsqrt(var + BN_EPS)
        shift = lay["beta"] - mean * scale
        # Fold BN into the linear layer: relu(scale*(xW+b)+shift) == relu(x(W*scale)+(b*scale+shift))
        wfs.append(lay["wt"] * scale)
        bfs.append(lay["b"] * scale + shift)

    # ---- final pass: rows independent -> "parallel" (megacore) -------------
    E = layers[-1]["dout"]
    n_tiles_final = _cdiv(M, tm)          # does not need to cover the stats-grid padding
    m_out = n_tiles_final * tm

    in_specs = [x_spec_final]
    args = [x]
    for wf in wfs:
        in_specs.append(const1(wf)); args.append(wf)
    for bf in bfs:
        in_specs.append(const1(bf)); args.append(bf)

    out = pl.pallas_call(
        functools.partial(_final_kernel, n_layers=L, d_out=E),
        out_shape=jax.ShapeDtypeStruct((m_out, E), jnp.float32),
        grid=(n_tiles_final,),
        in_specs=in_specs,
        out_specs=pl.BlockSpec((tm, E), lambda i: (i, 0)),
        compiler_params=pltpu.CompilerParams(
            dimension_semantics=("parallel",),
            vmem_limit_bytes=VMEM_LIMIT),
    )(*args)

    if m_out != M:
        out = out[:M]
    return out.reshape(N, S, E)


# --------------------------------------------------------------------------- #
# Parameters / reference / test
# --------------------------------------------------------------------------- #
def init_pixel_encoding_params(sizes, key):
    """Deterministic synthetic params matching nn.Linear / nn.BatchNorm1d shapes."""
    params = []
    for i in range(1, len(sizes)):
        din, dout = sizes[i - 1], sizes[i]
        key, kw, kb = jax.random.split(key, 3)
        bound = 1.0 / jnp.sqrt(jnp.float32(din))
        w = jax.random.uniform(kw, (dout, din), jnp.float32, -bound, bound)
        b = jax.random.uniform(kb, (dout,), jnp.float32, -bound, bound)
        gamma = jnp.ones((dout,), jnp.float32)
        beta = jnp.zeros((dout,), jnp.float32)
        params.append((w, b, gamma, beta))
    return params


def _reference_forward(ts, params):
    """Pure-JAX reference (training-mode BatchNorm1d, biased variance)."""
    N, S, B = ts.shape
    x = ts.reshape(N * S, B).astype(jnp.float32)
    for (w, b, gamma, beta) in params:
        y = x @ w.T + b
        mean = jnp.mean(y, axis=0, keepdims=True)
        var = jnp.mean((y - mean) ** 2, axis=0, keepdims=True)
        x = jnp.maximum((y - mean) / jnp.sqrt(var + BN_EPS) * gamma + beta, 0.0)
    return x.reshape(N, S, -1)


if __name__ == "__main__":
    sizes = [4, 32, 32]
    key = jax.random.PRNGKey(0)
    key, k1, k2 = jax.random.split(key, 3)
    params = init_pixel_encoding_params(sizes, key)

    # Small shape from the module spec: N=2, S=8, B=4 bands -> E=32.
    ts = jax.random.normal(k1, (2, 8, sizes[0]), jnp.float32)
    out = jax.block_until_ready(pixel_encoding_forward(ts, params))
    ref = _reference_forward(ts, params)
    assert out.shape == (2, 8, sizes[-1]), out.shape
    assert jnp.allclose(out, ref, atol=1e-4, rtol=1e-4), "mismatch vs. reference (small)"

    # Larger shape: exercises the tiled grid, the megacore-split stats grid,
    # multi-step accumulation, row masking (M not a multiple of the tile) and
    # the "parallel" final pass.
    ts_big = jax.random.normal(k2, (4, 1100, sizes[0]), jnp.float32)
    out_big = jax.block_until_ready(pixel_encoding_forward(ts_big, params))
    ref_big = _reference_forward(ts_big, params)
    assert out_big.shape == (4, 1100, sizes[-1]), out_big.shape
    assert jnp.allclose(out_big, ref_big, atol=1e-3, rtol=1e-3), "mismatch vs. reference (tiled)"

    print("KERNEL_OK")
</pallas_src>

<mosaic_0001>
module attributes {stable_mosaic.version = 11 : i64} {
  func.func @_stats_kernel(%arg0: i32, %arg1: i32, %arg2: memref<8x4xf32, #tpu.memory_space<vmem>>, %arg3: memref<4x128xf32, #tpu.memory_space<vmem>>, %arg4: memref<1x128xf32, #tpu.memory_space<vmem>>, %arg5: memref<1x2x128xf32, #tpu.memory_space<vmem>>) attributes {dimension_semantics = [#tpu.dimension_semantics<parallel>, #tpu.dimension_semantics<arbitrary>], iteration_bounds = array<i64: 2, 1>, scalar_prefetch = 0 : i64, scratch_operands = 0 : i64, tpu.core_type = #tpu.core_type<tc>, window_params = [{transform_indices = @transform_0, window_bounds = array<i64: 8, 4>}, {pipeline_mode = #tpu.pipeline_mode<synchronous>, transform_indices = @transform_1, window_bounds = array<i64: 4, 128>}, {pipeline_mode = #tpu.pipeline_mode<synchronous>, transform_indices = @transform_2, window_bounds = array<i64: 1, 128>}, {transform_indices = @transform_3, window_bounds = array<i64: 1, 2, 128>}]} {
    %c0_i32 = arith.constant 0 : i32
    %0 = arith.cmpi eq, %arg1, %c0_i32 : i32
    %1 = arith.extui %0 : i1 to i32
    %c0_i32_0 = arith.constant 0 : i32
    %2 = arith.cmpi ne, %1, %c0_i32_0 : i32
    scf.if %2 {
      %cst_14 = arith.constant 0.000000e+00 : f32
      %19 = vector.broadcast %cst_14 : f32 to vector<1x2x128xf32>
      %c0_15 = arith.constant 0 : index
      %c0_16 = arith.constant 0 : index
      %c0_17 = arith.constant 0 : index
      %20 = vector.load %arg5[%c0_15, %c0_16, %c0_17] : memref<1x2x128xf32, #tpu.memory_space<vmem>>, vector<1x2x128xf32>
      tpu.vector_store %arg5[%c0_15, %c0_16, %c0_17], %19 {strides = array<i32>} : memref<1x2x128xf32, #tpu.memory_space<vmem>>, vector<1x2x128xf32>,
    } else {
    }
    %c0 = arith.constant 0 : index
    %c0_1 = arith.constant 0 : index
    %3 = vector.load %arg2[%c0, %c0_1] : memref<8x4xf32, #tpu.memory_space<vmem>>, vector<8x4xf32>
    %c0_2 = arith.constant 0 : index
    %c0_3 = arith.constant 0 : index
    %4 = vector.load %arg3[%c0_2, %c0_3] : memref<4x128xf32, #tpu.memory_space<vmem>>, vector<4x128xf32>
    %cst = arith.constant dense<0.000000e+00> : vector<8x128xf32>
    %5 = tpu.matmul %3, %4, %cst {dimension_numbers = #tpu.dot_dimension_numbers<[1], [0], [0], [1], [0, 0, 1, 1], [], []>} : vector<8x4xf32>, vector<4x128xf32>, vector<8x128xf32> -> vector<8x128xf32>
    %c0_4 = arith.constant 0 : index
    %c0_5 = arith.constant 0 : index
    %6 = vector.load %arg4[%c0_4, %c0_5] : memref<1x128xf32, #tpu.memory_space<vmem>>, vector<1x128xf32>
    %7 = vector.broadcast %6 : vector<1x128xf32> to vector<8x128xf32>
    %8 = arith.addf %5, %7 : vector<8x128xf32>
    %cst_6 = arith.constant dense<0.000000e+00> : vector<128xf32>
    %9 = vector.multi_reduction <add>, %8, %cst_6 [0] : vector<8x128xf32> to vector<128xf32>
    %10 = vector.shape_cast %9 : vector<128xf32> to vector<1x128xf32>
    %11 = arith.mulf %8, %8 : vector<8x128xf32>
    %cst_7 = arith.constant dense<0.000000e+00> : vector<128xf32>
    %12 = vector.multi_reduction <add>, %11, %cst_7 [0] : vector<8x128xf32> to vector<128xf32>
    %13 = vector.shape_cast %12 : vector<128xf32> to vector<1x128xf32>
    %c0_8 = arith.constant 0 : index
    %c0_9 = arith.constant 0 : index
    %c0_10 = arith.constant 0 : index
    %14 = vector.load %arg5[%c0_8, %c0_9, %c0_10] : memref<1x2x128xf32, #tpu.memory_space<vmem>>, vector<1x2x128xf32>
    %15 = tpu.concatenate %10, %13 in 0 : vector<1x128xf32>, vector<1x128xf32> -> vector<2x128xf32>
    %16 = vector.shape_cast %15 : vector<2x128xf32> to vector<1x2x128xf32>
    %17 = arith.addf %14, %16 : vector<1x2x128xf32>
    %c0_11 = arith.constant 0 : index
    %c0_12 = arith.constant 0 : index
    %c0_13 = arith.constant 0 : index
    %18 = vector.load %arg5[%c0_11, %c0_12, %c0_13] : memref<1x2x128xf32, #tpu.memory_space<vmem>>, vector<1x2x128xf32>
    tpu.vector_store %arg5[%c0_11, %c0_12, %c0_13], %17 {strides = array<i32>} : memref<1x2x128xf32, #tpu.memory_space<vmem>>, vector<1x2x128xf32>,
    return
  }
  func.func @transform_0(%arg0: i32, %arg1: i32) -> (i32, i32) {
    %c1_i32 = arith.constant 1 : i32
    %0 = arith.muli %arg0, %c1_i32 : i32
    %1 = arith.addi %0, %arg1 : i32
    %c0_i32 = arith.constant 0 : i32
    %c0_i32_0 = arith.constant 0 : i32
    return %1, %c0_i32 : i32, i32
  }
  func.func @transform_1(%arg0: i32, %arg1: i32) -> (i32, i32) {
    %c0_i32 = arith.constant 0 : i32
    %c0_i32_0 = arith.constant 0 : i32
    %c0_i32_1 = arith.constant 0 : i32
    return %c0_i32, %c0_i32_0 : i32, i32
  }
  func.func @transform_2(%arg0: i32, %arg1: i32) -> (i32, i32) {
    %c0_i32 = arith.constant 0 : i32
    %c0_i32_0 = arith.constant 0 : i32
    %c0_i32_1 = arith.constant 0 : i32
    return %c0_i32, %c0_i32_0 : i32, i32
  }
  func.func @transform_3(%arg0: i32, %arg1: i32) -> (i32, i32, i32) {
    %c0_i32 = arith.constant 0 : i32
    %c0_i32_0 = arith.constant 0 : i32
    %c0_i32_1 = arith.constant 0 : i32
    return %arg0, %c0_i32, %c0_i32_0 : i32, i32, i32
  }
}

module attributes {stable_mosaic.version = 11 : i64} {
  func.func @_final_kernel(%arg0: i32, %arg1: memref<8x4xf32, #tpu.memory_space<vmem>>, %arg2: memref<4x128xf32, #tpu.memory_space<vmem>>, %arg3: memref<128x128xf32, #tpu.memory_space<vmem>>, %arg4: memref<1x128xf32, #tpu.memory_space<vmem>>, %arg5: memref<1x128xf32, #tpu.memory_space<vmem>>, %arg6: memref<8x32xf32, #tpu.memory_space<vmem>>) attributes {dimension_semantics = [#tpu.dimension_semantics<parallel>], iteration_bounds = array<i64: 2>, scalar_prefetch = 0 : i64, scratch_operands = 0 : i64, tpu.core_type = #tpu.core_type<tc>, window_params = [{transform_indices = @transform_0, window_bounds = array<i64: 8, 4>}, {pipeline_mode = #tpu.pipeline_mode<synchronous>, transform_indices = @transform_1, window_bounds = array<i64: 4, 128>}, {pipeline_mode = #tpu.pipeline_mode<synchronous>, transform_indices = @transform_2, window_bounds = array<i64: 128, 128>}, {pipeline_mode = #tpu.pipeline_mode<synchronous>, transform_indices = @transform_3, window_bounds = array<i64: 1, 128>}, {pipeline_mode = #tpu.pipeline_mode<synchronous>, transform_indices = @transform_4, window_bounds = array<i64: 1, 128>}, {transform_indices = @transform_5, window_bounds = array<i64: 8, 32>}]} {
    %c0 = arith.constant 0 : index
    %c0_0 = arith.constant 0 : index
    %0 = vector.load %arg1[%c0, %c0_0] : memref<8x4xf32, #tpu.memory_space<vmem>>, vector<8x4xf32>
    %c0_1 = arith.constant 0 : index
    %c0_2 = arith.constant 0 : index
    %1 = vector.load %arg2[%c0_1, %c0_2] : memref<4x128xf32, #tpu.memory_space<vmem>>, vector<4x128xf32>
    %cst = arith.constant dense<0.000000e+00> : vector<8x128xf32>
    %2 = tpu.matmul %0, %1, %cst {dimension_numbers = #tpu.dot_dimension_numbers<[1], [0], [0], [1], [0, 0, 1, 1], [], []>} : vector<8x4xf32>, vector<4x128xf32>, vector<8x128xf32> -> vector<8x128xf32>
    %c0_3 = arith.constant 0 : index
    %c0_4 = arith.constant 0 : index
    %3 = vector.load %arg4[%c0_3, %c0_4] : memref<1x128xf32, #tpu.memory_space<vmem>>, vector<1x128xf32>
    %4 = vector.broadcast %3 : vector<1x128xf32> to vector<8x128xf32>
    %5 = arith.addf %2, %4 : vector<8x128xf32>
    %cst_5 = arith.constant 0.000000e+00 : f32
    %6 = vector.broadcast %cst_5 : f32 to vector<8x128xf32>
    %7 = arith.maximumf %5, %6 : vector<8x128xf32>
    %c0_6 = arith.constant 0 : index
    %c0_7 = arith.constant 0 : index
    %8 = vector.load %arg3[%c0_6, %c0_7] : memref<128x128xf32, #tpu.memory_space<vmem>>, vector<128x128xf32>
    %cst_8 = arith.constant dense<0.000000e+00> : vector<8x128xf32>
    %9 = tpu.matmul %7, %8, %cst_8 {dimension_numbers = #tpu.dot_dimension_numbers<[1], [0], [0], [1], [0, 0, 1, 1], [], []>} : vector<8x128xf32>, vector<128x128xf32>, vector<8x128xf32> -> vector<8x128xf32>
    %c0_9 = arith.constant 0 : index
    %c0_10 = arith.constant 0 : index
    %10 = vector.load %arg5[%c0_9, %c0_10] : memref<1x128xf32, #tpu.memory_space<vmem>>, vector<1x128xf32>
    %11 = vector.broadcast %10 : vector<1x128xf32> to vector<8x128xf32>
    %12 = arith.addf %9, %11 : vector<8x128xf32>
    %cst_11 = arith.constant 0.000000e+00 : f32
    %13 = vector.broadcast %cst_11 : f32 to vector<8x128xf32>
    %14 = arith.maximumf %12, %13 : vector<8x128xf32>
    %15 = vector.extract_strided_slice %14 {offsets = [0, 0], sizes = [8, 32], strides = [1, 1]} : vector<8x128xf32> to vector<8x32xf32>
    %c0_12 = arith.constant 0 : index
    %c0_13 = arith.constant 0 : index
    %16 = vector.load %arg6[%c0_12, %c0_13] : memref<8x32xf32, #tpu.memory_space<vmem>>, vector<8x32xf32>
    tpu.vector_store %arg6[%c0_12, %c0_13], %15 {strides = array<i32>} : memref<8x32xf32, #tpu.memory_space<vmem>>, vector<8x32xf32>,
    return
  }
  func.func @transform_0(%arg0: i32) -> (i32, i32) {
    %c0_i32 = arith.constant 0 : i32
    %c0_i32_0 = arith.constant 0 : i32
    return %arg0, %c0_i32 : i32, i32
  }
  func.func @transform_1(%arg0: i32) -> (i32, i32) {
    %c0_i32 = arith.constant 0 : i32
    %c0_i32_0 = arith.constant 0 : i32
    %c0_i32_1 = arith.constant 0 : i32
    return %c0_i32, %c0_i32_0 : i32, i32
  }
  func.func @transform_2(%arg0: i32) -> (i32, i32) {
    %c0_i32 = arith.constant 0 : i32
    %c0_i32_0 = arith.constant 0 : i32
    %c0_i32_1 = arith.constant 0 : i32
    return %c0_i32, %c0_i32_0 : i32, i32
  }
  func.func @transform_3(%arg0: i32) -> (i32, i32) {
    %c0_i32 = arith.constant 0 : i32
    %c0_i32_0 = arith.constant 0 : i32
    %c0_i32_1 = arith.constant 0 : i32
    return %c0_i32, %c0_i32_0 : i32, i32
  }
  func.func @transform_4(%arg0: i32) -> (i32, i32) {
    %c0_i32 = arith.constant 0 : i32
    %c0_i32_0 = arith.constant 0 : i32
    %c0_i32_1 = arith.constant 0 : i32
    return %c0_i32, %c0_i32_0 : i32, i32
  }
  func.func @transform_5(%arg0: i32) -> (i32, i32) {
    %c0_i32 = arith.constant 0 : i32
    %c0_i32_0 = arith.constant 0 : i32
    return %arg0, %c0_i32 : i32, i32
  }
}

module attributes {stable_mosaic.version = 11 : i64} {
  func.func @_stats_kernel(%arg0: i32, %arg1: i32, %arg2: memref<8x4xf32, #tpu.memory_space<vmem>>, %arg3: memref<4x128xf32, #tpu.memory_space<vmem>>, %arg4: memref<1x128xf32, #tpu.memory_space<vmem>>, %arg5: memref<128x128xf32, #tpu.memory_space<vmem>>, %arg6: memref<1x128xf32, #tpu.memory_space<vmem>>, %arg7: memref<1x2x128xf32, #tpu.memory_space<vmem>>) attributes {dimension_semantics = [#tpu.dimension_semantics<parallel>, #tpu.dimension_semantics<arbitrary>], iteration_bounds = array<i64: 2, 1>, scalar_prefetch = 0 : i64, scratch_operands = 0 : i64, tpu.core_type = #tpu.core_type<tc>, window_params = [{transform_indices = @transform_0, window_bounds = array<i64: 8, 4>}, {pipeline_mode = #tpu.pipeline_mode<synchronous>, transform_indices = @transform_1, window_bounds = array<i64: 4, 128>}, {pipeline_mode = #tpu.pipeline_mode<synchronous>, transform_indices = @transform_2, window_bounds = array<i64: 1, 128>}, {pipeline_mode = #tpu.pipeline_mode<synchronous>, transform_indices = @transform_3, window_bounds = array<i64: 128, 128>}, {pipeline_mode = #tpu.pipeline_mode<synchronous>, transform_indices = @transform_4, window_bounds = array<i64: 1, 128>}, {transform_indices = @transform_5, window_bounds = array<i64: 1, 2, 128>}]} {
    %c0_i32 = arith.constant 0 : i32
    %0 = arith.cmpi eq, %arg1, %c0_i32 : i32
    %1 = arith.extui %0 : i1 to i32
    %c0_i32_0 = arith.constant 0 : i32
    %2 = arith.cmpi ne, %1, %c0_i32_0 : i32
    scf.if %2 {
      %cst_20 = arith.constant 0.000000e+00 : f32
      %26 = vector.broadcast %cst_20 : f32 to vector<1x2x128xf32>
      %c0_21 = arith.constant 0 : index
      %c0_22 = arith.constant 0 : index
      %c0_23 = arith.constant 0 : index
      %27 = vector.load %arg7[%c0_21, %c0_22, %c0_23] : memref<1x2x128xf32, #tpu.memory_space<vmem>>, vector<1x2x128xf32>
      tpu.vector_store %arg7[%c0_21, %c0_22, %c0_23], %26 {strides = array<i32>} : memref<1x2x128xf32, #tpu.memory_space<vmem>>, vector<1x2x128xf32>,
    } else {
    }
    %c0 = arith.constant 0 : index
    %c0_1 = arith.constant 0 : index
    %3 = vector.load %arg2[%c0, %c0_1] : memref<8x4xf32, #tpu.memory_space<vmem>>, vector<8x4xf32>
    %c0_2 = arith.constant 0 : index
    %c0_3 = arith.constant 0 : index
    %4 = vector.load %arg3[%c0_2, %c0_3] : memref<4x128xf32, #tpu.memory_space<vmem>>, vector<4x128xf32>
    %cst = arith.constant dense<0.000000e+00> : vector<8x128xf32>
    %5 = tpu.matmul %3, %4, %cst {dimension_numbers = #tpu.dot_dimension_numbers<[1], [0], [0], [1], [0, 0, 1, 1], [], []>} : vector<8x4xf32>, vector<4x128xf32>, vector<8x128xf32> -> vector<8x128xf32>
    %c0_4 = arith.constant 0 : index
    %c0_5 = arith.constant 0 : index
    %6 = vector.load %arg4[%c0_4, %c0_5] : memref<1x128xf32, #tpu.memory_space<vmem>>, vector<1x128xf32>
    %7 = vector.broadcast %6 : vector<1x128xf32> to vector<8x128xf32>
    %8 = arith.addf %5, %7 : vector<8x128xf32>
    %cst_6 = arith.constant 0.000000e+00 : f32
    %9 = vector.broadcast %cst_6 : f32 to vector<8x128xf32>
    %10 = arith.maximumf %8, %9 : vector<8x128xf32>
    %c0_7 = arith.constant 0 : index
    %c0_8 = arith.constant 0 : index
    %11 = vector.load %arg5[%c0_7, %c0_8] : memref<128x128xf32, #tpu.memory_space<vmem>>, vector<128x128xf32>
    %cst_9 = arith.constant dense<0.000000e+00> : vector<8x128xf32>
    %12 = tpu.matmul %10, %11, %cst_9 {dimension_numbers = #tpu.dot_dimension_numbers<[1], [0], [0], [1], [0, 0, 1, 1], [], []>} : vector<8x128xf32>, vector<128x128xf32>, vector<8x128xf32> -> vector<8x128xf32>
    %c0_10 = arith.constant 0 : index
    %c0_11 = arith.constant 0 : index
    %13 = vector.load %arg6[%c0_10, %c0_11] : memref<1x128xf32, #tpu.memory_space<vmem>>, vector<1x128xf32>
    %14 = vector.broadcast %13 : vector<1x128xf32> to vector<8x128xf32>
    %15 = arith.addf %12, %14 : vector<8x128xf32>
    %cst_12 = arith.constant dense<0.000000e+00> : vector<128xf32>
    %16 = vector.multi_reduction <add>, %15, %cst_12 [0] : vector<8x128xf32> to vector<128xf32>
    %17 = vector.shape_cast %16 : vector<128xf32> to vector<1x128xf32>
    %18 = arith.mulf %15, %15 : vector<8x128xf32>
    %cst_13 = arith.constant dense<0.000000e+00> : vector<128xf32>
    %19 = vector.multi_reduction <add>, %18, %cst_13 [0] : vector<8x128xf32> to vector<128xf32>
    %20 = vector.shape_cast %19 : vector<128xf32> to vector<1x128xf32>
    %c0_14 = arith.constant 0 : index
    %c0_15 = arith.constant 0 : index
    %c0_16 = arith.constant 0 : index
    %21 = vector.load %arg7[%c0_14, %c0_15, %c0_16] : memref<1x2x128xf32, #tpu.memory_space<vmem>>, vector<1x2x128xf32>
    %22 = tpu.concatenate %17, %20 in 0 : vector<1x128xf32>, vector<1x128xf32> -> vector<2x128xf32>
    %23 = vector.shape_cast %22 : vector<2x128xf32> to vector<1x2x128xf32>
    %24 = arith.addf %21, %23 : vector<1x2x128xf32>
    %c0_17 = arith.constant 0 : index
    %c0_18 = arith.constant 0 : index
    %c0_19 = arith.constant 0 : index
    %25 = vector.load %arg7[%c0_17, %c0_18, %c0_19] : memref<1x2x128xf32, #tpu.memory_space<vmem>>, vector<1x2x128xf32>
    tpu.vector_store %arg7[%c0_17, %c0_18, %c0_19], %24 {strides = array<i32>} : memref<1x2x128xf32, #tpu.memory_space<vmem>>, vector<1x2x128xf32>,
    return
  }
  func.func @transform_0(%arg0: i32, %arg1: i32) -> (i32, i32) {
    %c1_i32 = arith.constant 1 : i32
    %0 = arith.muli %arg0, %c1_i32 : i32
    %1 = arith.addi %0, %arg1 : i32
    %c0_i32 = arith.constant 0 : i32
    %c0_i32_0 = arith.constant 0 : i32
    return %1, %c0_i32 : i32, i32
  }
  func.func @transform_1(%arg0: i32, %arg1: i32) -> (i32, i32) {
    %c0_i32 = arith.constant 0 : i32
    %c0_i32_0 = arith.constant 0 : i32
    %c0_i32_1 = arith.constant 0 : i32
    return %c0_i32, %c0_i32_0 : i32, i32
  }
  func.func @transform_2(%arg0: i32, %arg1: i32) -> (i32, i32) {
    %c0_i32 = arith.constant 0 : i32
    %c0_i32_0 = arith.constant 0 : i32
    %c0_i32_1 = arith.constant 0 : i32
    return %c0_i32, %c0_i32_0 : i32, i32
  }
  func.func @transform_3(%arg0: i32, %arg1: i32) -> (i32, i32) {
    %c0_i32 = arith.constant 0 : i32
    %c0_i32_0 = arith.constant 0 : i32
    %c0_i32_1 = arith.constant 0 : i32
    return %c0_i32, %c0_i32_0 : i32, i32
  }
  func.func @transform_4(%arg0: i32, %arg1: i32) -> (i32, i32) {
    %c0_i32 = arith.constant 0 : i32
    %c0_i32_0 = arith.constant 0 : i32
    %c0_i32_1 = arith.constant 0 : i32
    return %c0_i32, %c0_i32_0 : i32, i32
  }
  func.func @transform_5(%arg0: i32, %arg1: i32) -> (i32, i32, i32) {
    %c0_i32 = arith.constant 0 : i32
    %c0_i32_0 = arith.constant 0 : i32
    %c0_i32_1 = arith.constant 0 : i32
    return %arg0, %c0_i32, %c0_i32_0 : i32, i32, i32
  }
}

</mosaic_0001>

<bundles_post_ra>
// kernel: pixel_encoding_forward.5
= control target key start
LH: loop header
LB: loop body
LE: loop exit
PB: predicated region body
PF: predicated region fallthrough
CT: control target
= control target key end

     0   :  { %10 = vsyncpa [#allocation3], 0  ;;  %s871_s0 = inlined_call_operand.vmem [shape: f32[16,4], index: 0, kind: input, shape index: {}]   ;;  %s872_s1 = inlined_call_operand.vmem [shape: f32[4,128], index: 1, kind: input, shape index: {}]   ;;  %s873_s2 = inlined_call_operand.vmem [shape: f32[128,128], index: 2, kind: input, shape index: {}]   ;;  %s874_s3 = inlined_call_operand.vmem [shape: f32[1,128], index: 3, kind: input, shape index: {}]   ;;  %s875_s4 = inlined_call_operand.vmem [shape: f32[1,128], index: 4, kind: input, shape index: {}]   ;;  %s876_s5 = inlined_call_operand.hbm [shape: f32[16,32], index: 5, kind: output, shape index: {}]  }
   0x1   :  { %12 = vsyncpa [#allocation3 + $0x1], 0  ;;  %s714_s18 = smov 0   ;;  %s716_s19 = smov 0  }
   0x2   :  { %s718_s20 = smov 0   ;;  %s720_s21 = smov 0  }
   0x3 LB: > { %s735_s22 = sadd.s32 4294967295, %s678_s21   ;;  %s477_s23 = sadd.s32 4294967294, %s678_s21   ;;  %s678_s21 = sphi %s720_s21, %s882_s21   ;;  %s674_s20 = sphi %s718_s20, %s881_s20   ;;  %s670_s19 = sphi %s716_s19, %s880_s19   ;;  %s666_s18 = sphi %s714_s18, %s879_s18  }
   0x4   : > { %s739_s24 = sadd.s32 1, %s678_s21   ;;  %s135_s25 = sadd.s32 1, %s674_s20 }
   0x5   : > { %s132_s26 = ssub.s32 %s678_s21, %s739_s24  ;;  %p145_p0 = scmp.ne.s32.totalorder %s674_s20, %s670_s19 }
   0x6   : > { %p133_p1 = scmp.eq.s32.totalorder %s132_s26, 0  ;;  %p146_p2 = scmp.eq.s32.totalorder %s735_s22, 1 }
   0x7   : > { %p151_p3 = scmp.ne.s32.totalorder %s670_s19, %s666_s18  ;;  %p152_p4 = scmp.eq.s32.totalorder %s477_s23, 1 }
   0x8   : > { %s750_s27 = scalar_select %p133_p1, %s674_s20, %s135_s25  }
   0x9   : > { %p752_p5 = por %p146_p2, %p145_p0  ;;  %p756_p6 = por %p152_p4, %p151_p3 }
   0xa   : > { %p480_p7 = scmp.ge.s32.totalorder %s678_s21, 1  ;;  %p189_p8 = scmp.lt.s32.totalorder %s678_s21, 3 }
   0xc   : > { %p190_p9 = pnand %p480_p7, %p189_p8 }
   0xd   : > { %v221_v0 = vld [vmem:[%s872_s1] sm:$0xf] (!%p190_p9)  ;;  %vm233_vm0 = vcmask (!%p190_p9), 1043456   ;;  %p216_p10 = scmp.lt.s32.totalorder (!%p190_p9), %s735_s22, 1  ;;  %v680_v1 = vmov (!%p190_p9), 0.0   ;;  %vm681_vm1 = vmmov (!%p190_p9), 0  }
   0xe   : > { %193 = sbr.rel (%p190_p9) target bundleno = 472 (0x1d8), region = 40  ;;  %510 = vmatprep.subr.mxu0 (!%p190_p9), %v680_v1  ;;  %512 = vmatprep.mubr.msk.f32.mxu0 (!%p190_p9), %vm681_vm1, %v680_v1  ;;  %v308_v2 = vld [vmem:[%s873_s2] sm:$0xff] (!%p190_p9)  ;;  %v309_v3 = vld [vmem:[%s873_s2 + $0x8] sm:$0xff] (!%p190_p9)  ;;  %v310_v4 = vld [vmem:[%s873_s2 + $0x10] sm:$0xff] (!%p190_p9)  ;;  %v682_v5 = vmov (!%p190_p9), 0.0|0.0   ;;  %vm229_vm2 = vcmask (!%p190_p9), 31744  }
   0xf   : > { %511 = vmatpush3.msk.msra.mxu0 (!%p190_p9), %vm233_vm0, %v221_v0  ;;  %550 = vmatprep.subr.bf16.mxu1 (!%p190_p9), %v682_v5  ;;  %v551_v6 = vpack.c.bf16 (!%p190_p9), %v309_v3, %v308_v2  ;;  %v311_v7 = vld [vmem:[%s873_s2 + $0x18] sm:$0xff] (!%p190_p9)  ;;  %v312_v9 = vld [vmem:[%s873_s2 + $0x20] sm:$0xff] (!%p190_p9)  ;;  %v313_v10 = vld [vmem:[%s873_s2 + $0x28] sm:$0xff] (!%p190_p9)  ;;  %s213_s14 = sand.u32 (!%p190_p9), 1, %s670_s19   ;;  %s488_s23 = sshll.u32 (!%p190_p9), %s735_s22, 7  ;;  %vm402_vm3 = vcmask (!%p190_p9), 261120  }
  0x10   : > { %547 = vmatprep.mubr.msk.f32.mxu1 (!%p190_p9), %vm681_vm1, %v680_v1  ;;  %v554_v8 = vpack.c.bf16 (!%p190_p9), %v311_v7, %v310_v4  ;;  %v557_v12 = vpack.c.bf16 (!%p190_p9), %v313_v10, %v312_v9  ;;  %v314_v13 = vld [vmem:[%s873_s2 + $0x30] sm:$0xff] (!%p190_p9)  ;;  %v315_v14 = vld [vmem:[%s873_s2 + $0x38] sm:$0xff] (!%p190_p9)  ;;  %v316_v16 = vld [vmem:[%s873_s2 + $0x40] sm:$0xff] (!%p190_p9)  ;;  %s481_s15 = sshll.u32 (!%p190_p9), %s213_s14, 3  ;;  %s829_s7 = scalar_lea.hbm (!%p190_p9), %s876_s5, %s488_s23 }
  0x11   : > { %552 = vmatpush3.bf16.msra.mxu1 (!%p190_p9), %v551_v6  ;;  %v560_v15 = vpack.c.bf16 (!%p190_p9), %v315_v14, %v314_v13  ;;  %v317_v17 = vld [vmem:[%s873_s2 + $0x48] sm:$0xff] (!%p190_p9)  ;;  %v318_v19 = vld [vmem:[%s873_s2 + $0x50] sm:$0xff] (!%p190_p9)  ;;  %v319_v20 = vld [vmem:[%s873_s2 + $0x58] sm:$0xff] (!%p190_p9)  ;;  %s405_s8 = scalar_lea.sflag (!%p190_p9), [#allocation3], %s213_s14 }
  0x12   : > { %553 = vmatprep.subr.bf16.mxu1 (!%p190_p9), %v682_v5  ;;  %v563_v18 = vpack.c.bf16 (!%p190_p9), %v317_v17, %v316_v16  ;;  %v566_v21 = vpack.c.bf16 (!%p190_p9), %v319_v20, %v318_v19  ;;  %v320_v22 = vld [vmem:[%s873_s2 + $0x60] sm:$0xff] (!%p190_p9)  ;;  %v321_v23 = vld [vmem:[%s873_s2 + $0x68] sm:$0xff] (!%p190_p9)  ;;  %v322_v25 = vld [vmem:[%s873_s2 + $0x70] sm:$0xff] (!%p190_p9) }
  0x13   : > { %v569_v24 = vpack.c.bf16 (!%p190_p9), %v321_v23, %v320_v22  ;;  %v323_v26 = vld [vmem:[%s873_s2 + $0x78] sm:$0xff] (!%p190_p9)  ;;  %v483_v28 = vld [vmem:[%s874_s3] ss:$0 sm:$0xff] (!%p190_p9) }
  0x14   : > { %v572_v27 = vpack.c.bf16 (!%p190_p9), %v323_v26, %v322_v25  ;;  %v486_v33 = vld [vmem:[%s875_s4] ss:$0 sm:$0xff] (!%p190_p9) }
  0x15   : > { %s217_s13 = scalar_select %p216_p10, %s735_s22, 1  ;;  %555 = vmatpush3.bf16.msra.mxu1 %v554_v8 }
  0x16   : > { %556 = vmatprep.subr.bf16.mxu1 %v682_v5  ;;  %s683_s22 = smov [#allocation2]  }
  0x17   : > { %s482_s16 = sshll.u32 %s217_s13, 3  ;;  %s620_s10 = sshll.u32 %s683_s22, 4  ;;  %s621_s10 = int_to_ptr.vmem [resolvable:$false] %s620_s10 }
  0x18   : > { %s219_s25 = scalar_lea.vmem %s871_s0, %s482_s16  ;;  %s622_s11 = scalar_lea.vmem %s621_s10, 256 }
  0x19   : > { %v220_v11 = vld [vmem:[%s219_s25] sm:$0xff]  ;;  %558 = vmatpush3.bf16.msra.mxu1 %v557_v12  ;;  %s215_s25 = scalar_lea.vmem [#allocation2], %s481_s15 }
  0x1a   : > { %513 = vmatmul.mubr.msk.f32.vlgmr.msra.gmra.mrb[0].mxu0 %vm229_vm2, %v220_v11  ;;  %559 = vmatprep.subr.bf16.mxu1 %v682_v5  ;;  %s418_s26 = sshll.u32 %s215_s25, 4  ;;  %s831_s26 = int_to_ptr.vmem [resolvable:$true] %s418_s26 }
  0x1b   : > { %s616_s9 = scalar_lea.vmem %s831_s26, 128  ;;  %p623_p0 = scmp.lt.s32.totalorder %s831_s26, %s621_s10 }
  0x1c   : > { %p617_p11 = scmp.ne.s32.totalorder %s831_s26, %s616_s9  ;;  %p624_p1 = scmp.lt.s32.totalorder %s622_s11, %s616_s9 }
  0x1d   : > { %561 = vmatpush3.bf16.msra.mxu1 %v560_v15 }
  0x1e   : > { %562 = vmatprep.subr.bf16.mxu1 %v682_v5  ;;  %p618_p12 = pnand %p617_p11, %p752_p5  ;;  %p625_p2 = por %p624_p1, %p623_p0 }
  0x20   : > { %p619_p13 = pneg %p618_p12 }
  0x21   : > { %564 = vmatpush3.bf16.msra.mxu1 %v563_v18 }
  0x22   : > { %565 = vmatprep.subr.bf16.mxu1 %v682_v5  ;;  %p626_p3 = pnand %p625_p2, %p619_p13 }
  0x25   : > { %567 = vmatpush3.bf16.msra.mxu1 %v566_v21 }
  0x26   : > { %568 = vmatprep.subr.bf16.mxu1 %v682_v5 }
  0x29   : > { %570 = vmatpush3.bf16.msra.mxu1 %v569_v24 }
  0x2a   : > { %571 = vmatprep.subr.bf16.mxu1 %v682_v5 }
  0x2d   : > { %573 = vmatpush3.bf16.msra.mxu1 %v572_v27 }
  0xed   : > { %v303_v29 = vpop.f32.mrb[0].mxu0 }
  0xee   : > { %v304_v30 = vadd.f32 %v483_v28, %v303_v29  ;;  %v514_v31 = vpop.f32.mrb[1].mxu0 }
  0xf0   : > { %v307_v32 = vmax.f32 %v304_v30, 0.0 }
  0xf2   : > { %548 = vmatmul.mubr.f32.vlgmr.msra.gmra.mrb[0].mxu1 %v307_v32 }
 0x1c5   : > { %v397_v34 = vpop.f32.mrb[0].mxu1 }
 0x1c6   : > { %v398_v35 = vadd.f32 %v486_v33, %v397_v34  ;;  %v549_v36 = vpop.f32.mrb[1].mxu1 }
 0x1c8   : > { %v401_v37 = vmax.f32 %v398_v35, 0.0 }
 0x1ca   : > { %403 = vst.msk [vmem:[%s215_s25] sm:$0xff] %vm402_vm3, %v401_v37 }
 0x1cb   : > { %629 = shalt.err (!%p626_p3)
}
 0x1cc   : > { %s630_s12 = scalar_lea.hbm %s829_s7, 128  ;;  %s634_s15 = scalar_lea.hbm %s876_s5, 256 }
 0x1cd   : > { %p631_p4 = scmp.ne.s32.totalorder %s829_s7, %s630_s12  ;;  %p635_p9 = scmp.lt.u32.totalorder %s829_s7, %s876_s5 }
 0x1ce   : > { %p636_p10 = scmp.lt.u32.totalorder %s634_s15, %s630_s12  ;;  %p638_p12 = scmp.lt.u32.totalorder %s630_s12, %s829_s7 }
 0x1cf   : > { %p632_p7 = pnand %p631_p4, %p752_p5 }
 0x1d0   : > { %p637_p11 = por %p636_p10, %p635_p9 }
 0x1d1   : > { %p633_p8 = pneg %p632_p7 }
 0x1d2   : > { %p639_p13 = por %p638_p12, %p637_p11 }
 0x1d4   : > { %p640_p0 = pnand %p639_p13, %p633_p8 }
 0x1d6   : > { %643 = shalt.err (!%p640_p0)
}
 0x1d7   : > { %574 = dma.vmem_to_hbm [thread:$0]  (%p752_p5), %s831_s26, 128, %s829_s7, %s405_s8  }
 0x1d8 PF: > { %p580_p1 = scmp.ge.s32.totalorder %s678_s21, 2  ;;  %s430_s23 = sand.u32 1, %s666_s18  }
 0x1d9   : > { %s431_s25 = scalar_lea.sflag [#allocation3], %s430_s23 }
 0x1da   : > { %p577_p2 = pnand %p580_p1, %p756_p6 }
 0x1dc   : > { %661 = dma.done.wait (!%p577_p2), %s431_s25, 128  }
 0x1dd   : > { %663 = vsyncadd (!%p577_p2), %s431_s25, 4294967168  ;;  %p15_p3 = scmp.ge.s32.totalorder %s739_s24, 4   ;;  %s879_s18 = smov %s670_s19 }
 0x1de   : > { %s880_s19 = smov %s674_s20  ;;  %s881_s20 = smov %s750_s27 }
 0x1df   : > { %s882_s21 = smov %s739_s24  ;;  %17 = sbr.rel (!%p15_p3) target bundleno = 3 (0x3), region = 75 }
 0x1e6   :  { %436 = vsyncpa [#allocation3], 1 }
 0x1e7   :  { %438 = vsyncpa [#allocation3 + $0x1], 1 }

// kernel: pixel_encoding_forward.3
= control target key start
LH: loop header
LB: loop body
LE: loop exit
PB: predicated region body
PF: predicated region fallthrough
CT: control target
= control target key end

     0   :  { %s447_s12 = smov 0   ;;  %s449_s13 = smov 0   ;;  %s486_s0 = inlined_call_operand.vmem [shape: f32[16,4], index: 0, kind: input, shape index: {}]   ;;  %s487_s1 = inlined_call_operand.vmem [shape: f32[4,128], index: 1, kind: input, shape index: {}]   ;;  %s488_s2 = inlined_call_operand.vmem [shape: f32[1,128], index: 2, kind: input, shape index: {}]   ;;  %s489_s3 = inlined_call_operand.vmem [shape: f32[2,2,128], index: 3, kind: output, shape index: {}]  }
   0x1   :  { %s451_s14 = smov 0  }
   0x2 LB: > { %s25_s15 = sadd.s32 1, %s419_s13  ;;  %p360_p0 = scmp.ge.s32.totalorder %s423_s14, 1  ;;  %s423_s14 = sphi %s451_s14, %s13_s14   ;;  %s419_s13 = sphi %s449_s13, %s491_s13   ;;  %s415_s12 = sphi %s447_s12, %s490_s12  }
   0x3   : > { %p27_p1 = scmp.ge.s32.totalorder %s25_s15, 2  ;;  %p152_p2 = scmp.lt.s32.totalorder %s423_s14, 3 }
   0x5   : > { %s493_s15 = smov (%p27_p1, %s25_s15), 0  ;;  %p153_p3 = pnand %p360_p0, %p152_p2 }
   0x6   : > { %p176_p4 = scmp.lt.s32.totalorder (!%p153_p3), %s415_s12, 1  ;;  %v191_v0 = vld [vmem:[%s487_s1] sm:$0xf] (!%p153_p3)  ;;  %vm203_vm0 = vcmask (!%p153_p3), 1043456   ;;  %v425_v1 = vmov (!%p153_p3), 0.0   ;;  %vm426_vm1 = vmmov (!%p153_p3), 0  }
   0x7   : > { %156 = sbr.rel (%p153_p3) target bundleno = 250 (0xfa), region = 32  ;;  %370 = vmatprep.subr.mxu0 (!%p153_p3), %v425_v1  ;;  %372 = vmatprep.mubr.msk.f32.mxu0 (!%p153_p3), %vm426_vm1, %v425_v1  ;;  %vm199_vm2 = vcmask (!%p153_p3), 31744   ;;  %v363_v3 = vld [vmem:[%s488_s2] ss:$0 sm:$0xff] (!%p153_p3)  ;;  %vm291_vm3 = vcmask (!%p153_p3), 1040384  }
   0x8   : > { %371 = vmatpush3.msk.msra.mxu0 (!%p153_p3), %vm203_vm0, %v191_v0 }
   0xe   : > { %s495_s12 = smov (!%p176_p4, %s415_s12), 1 }
   0xf   : > { %s362_s18 = sshll.u32 %s495_s12, 1  ;;  %s361_s19 = sshll.u32 %s495_s12, 3 }
  0x10   : > { %s184_s22 = scalar_lea.vmem %s489_s3, %s362_s18  ;;  %s179_s25 = scalar_lea.vmem %s486_s0, %s361_s19 }
  0x11   : > { %189 = vst [vmem:[%s184_s22] sm:$0x3] %v425_v1  ;;  %v190_v2 = vld [vmem:[%s179_s25] sm:$0xff] }
  0x12   : > { %373 = vmatmul.mubr.msk.f32.vlgmr.msra.gmra.mrb[0].mxu0 %vm199_vm2, %v190_v2 }
  0x18   : > { %v290_v18 = vld [vmem:[%s184_s22] sm:$0x3] }
  0xe5   : > { %v273_v4 = vpop.f32.mrb[0].mxu0 }
  0xe6   : > { %v274_v5 = vadd.f32 %v363_v3, %v273_v4  ;;  %v374_v6 = vpop.f32.mrb[1].mxu0 }
  0xe8   : > { %v277_v7 = vrot.slane %v274_v5, 4  ;;  %v283_v8 = vmul.f32 %v274_v5, %v274_v5 }
  0xea   : > { %v278_v9 = vadd.f32 %v277_v7, %v274_v5  ;;  %v284_v10 = vrot.slane %v283_v8, 4 }
  0xec   : > { %v279_v11 = vrot.slane %v278_v9, 2  ;;  %v285_v12 = vadd.f32 %v284_v10, %v283_v8 }
  0xee   : > { %v280_v13 = vadd.f32 %v279_v11, %v278_v9  ;;  %v286_v14 = vrot.slane %v285_v12, 2 }
  0xf0   : > { %v281_v15 = vrot.slane %v280_v13, 1  ;;  %v287_v16 = vadd.f32 %v286_v14, %v285_v12 }
  0xf2   : > { %v288_v17 = vrot.slane %v287_v16, 1  ;;  %v282_v19 = vadd.f32 %v281_v15, %v280_v13 }
  0xf4   : > { %v289_v20 = vadd.f32 %v288_v17, %v287_v16 }
  0xf6   : > { %v292_v21 = vsel %vm291_vm3, %v282_v19, %v289_v20 }
  0xf7   : > { %v293_v22 = vadd.f32 %v292_v21, %v290_v18 }
  0xf9   : > { %294 = vst [vmem:[%s184_s22] sm:$0x3] %v293_v22 }
  0xfa PF: > { %s13_s14 = sadd.s32 1, %s423_s14   ;;  %s490_s12 = smov %s419_s13 }
  0xfb   : > { %p10_p5 = scmp.ge.s32.totalorder %s13_s14, 4   ;;  %s491_s13 = smov %s493_s15 }
  0xfd   :  { %12 = sbr.rel (!%p10_p5) target bundleno = 2 (0x2), region = 66 }

// kernel: pixel_encoding_forward.4
= control target key start
LH: loop header
LB: loop body
LE: loop exit
PB: predicated region body
PF: predicated region fallthrough
CT: control target
= control target key end

     0   :  { %s684_s18 = smov 0   ;;  %s686_s19 = smov 0   ;;  %s779_s0 = inlined_call_operand.vmem [shape: f32[16,4], index: 0, kind: input, shape index: {}]   ;;  %s780_s1 = inlined_call_operand.vmem [shape: f32[4,128], index: 1, kind: input, shape index: {}]   ;;  %s781_s2 = inlined_call_operand.vmem [shape: f32[1,128], index: 2, kind: input, shape index: {}]   ;;  %s782_s3 = inlined_call_operand.vmem [shape: f32[128,128], index: 3, kind: input, shape index: {}]   ;;  %s783_s4 = inlined_call_operand.vmem [shape: f32[1,128], index: 4, kind: input, shape index: {}]   ;;  %s784_s5 = inlined_call_operand.vmem [shape: f32[2,2,128], index: 5, kind: output, shape index: {}]  }
   0x1   :  { %s688_s20 = smov 0  }
   0x2 LB: > { %s27_s21 = sadd.s32 1, %s645_s19  ;;  %p508_p0 = scmp.ge.s32.totalorder %s649_s20, 1  ;;  %s649_s20 = sphi %s688_s20, %s15_s20   ;;  %s645_s19 = sphi %s686_s19, %s786_s19   ;;  %s641_s18 = sphi %s684_s18, %s785_s18  }
   0x3   : > { %p29_p1 = scmp.ge.s32.totalorder %s27_s21, 2  ;;  %p202_p2 = scmp.lt.s32.totalorder %s649_s20, 3 }
   0x5   : > { %s788_s21 = smov (%p29_p1, %s27_s21), 0  ;;  %p203_p3 = pnand %p508_p0, %p202_p2 }
   0x6   : > { %v245_v0 = vld [vmem:[%s780_s1] sm:$0xf] (!%p203_p3)  ;;  %vm257_vm0 = vcmask (!%p203_p3), 1043456   ;;  %p230_p4 = scmp.lt.s32.totalorder (!%p203_p3), %s641_s18, 1  ;;  %v651_v1 = vmov (!%p203_p3), 0.0   ;;  %vm652_vm1 = vmmov (!%p203_p3), 0  }
   0x7   : > { %206 = sbr.rel (%p203_p3) target bundleno = 466 (0x1d2), region = 40  ;;  %536 = vmatprep.subr.mxu0 (!%p203_p3), %v651_v1  ;;  %538 = vmatprep.mubr.msk.f32.mxu0 (!%p203_p3), %vm652_vm1, %v651_v1  ;;  %v332_v2 = vld [vmem:[%s782_s3] sm:$0xff] (!%p203_p3)  ;;  %v333_v3 = vld [vmem:[%s782_s3 + $0x8] sm:$0xff] (!%p203_p3)  ;;  %v334_v4 = vld [vmem:[%s782_s3 + $0x10] sm:$0xff] (!%p203_p3)  ;;  %v653_v5 = vmov (!%p203_p3), 0.0|0.0   ;;  %vm253_vm2 = vcmask (!%p203_p3), 31744  }
   0x8   : > { %537 = vmatpush3.msk.msra.mxu0 (!%p203_p3), %vm257_vm0, %v245_v0  ;;  %576 = vmatprep.subr.bf16.mxu1 (!%p203_p3), %v653_v5  ;;  %v577_v6 = vpack.c.bf16 (!%p203_p3), %v333_v3, %v332_v2  ;;  %v335_v7 = vld [vmem:[%s782_s3 + $0x18] sm:$0xff] (!%p203_p3)  ;;  %v336_v9 = vld [vmem:[%s782_s3 + $0x20] sm:$0xff] (!%p203_p3)  ;;  %v337_v10 = vld [vmem:[%s782_s3 + $0x28] sm:$0xff] (!%p203_p3)  ;;  %vm439_vm3 = vcmask (!%p203_p3), 1040384  }
   0x9   : > { %573 = vmatprep.mubr.msk.f32.mxu1 (!%p203_p3), %vm652_vm1, %v651_v1  ;;  %v580_v8 = vpack.c.bf16 (!%p203_p3), %v335_v7, %v334_v4  ;;  %v583_v12 = vpack.c.bf16 (!%p203_p3), %v337_v10, %v336_v9  ;;  %v338_v13 = vld [vmem:[%s782_s3 + $0x30] sm:$0xff] (!%p203_p3)  ;;  %v339_v14 = vld [vmem:[%s782_s3 + $0x38] sm:$0xff] (!%p203_p3)  ;;  %v340_v16 = vld [vmem:[%s782_s3 + $0x40] sm:$0xff] (!%p203_p3) }
   0xa   : > { %578 = vmatpush3.bf16.msra.mxu1 (!%p203_p3), %v577_v6  ;;  %v586_v15 = vpack.c.bf16 (!%p203_p3), %v339_v14, %v338_v13  ;;  %v341_v17 = vld [vmem:[%s782_s3 + $0x48] sm:$0xff] (!%p203_p3)  ;;  %v342_v19 = vld [vmem:[%s782_s3 + $0x50] sm:$0xff] (!%p203_p3)  ;;  %v343_v20 = vld [vmem:[%s782_s3 + $0x58] sm:$0xff] (!%p203_p3) }
   0xb   : > { %579 = vmatprep.subr.bf16.mxu1 (!%p203_p3), %v653_v5  ;;  %v589_v18 = vpack.c.bf16 (!%p203_p3), %v341_v17, %v340_v16  ;;  %v592_v21 = vpack.c.bf16 (!%p203_p3), %v343_v20, %v342_v19  ;;  %v344_v22 = vld [vmem:[%s782_s3 + $0x60] sm:$0xff] (!%p203_p3)  ;;  %v345_v23 = vld [vmem:[%s782_s3 + $0x68] sm:$0xff] (!%p203_p3)  ;;  %v346_v25 = vld [vmem:[%s782_s3 + $0x70] sm:$0xff] (!%p203_p3) }
   0xc   : > { %v595_v24 = vpack.c.bf16 (!%p203_p3), %v345_v23, %v344_v22  ;;  %v347_v26 = vld [vmem:[%s782_s3 + $0x78] sm:$0xff] (!%p203_p3)  ;;  %v511_v28 = vld [vmem:[%s781_s2] ss:$0 sm:$0xff] (!%p203_p3) }
   0xd   : > { %v598_v27 = vpack.c.bf16 (!%p203_p3), %v347_v26, %v346_v25  ;;  %v514_v33 = vld [vmem:[%s783_s4] ss:$0 sm:$0xff] (!%p203_p3) }
   0xe   : > { %s790_s18 = smov (!%p230_p4, %s641_s18), 1  ;;  %581 = vmatpush3.bf16.msra.mxu1 %v580_v8 }
   0xf   : > { %s509_s7 = sshll.u32 %s790_s18, 3  ;;  %s510_s8 = sshll.u32 %s790_s18, 1  ;;  %582 = vmatprep.subr.bf16.mxu1 %v653_v5 }
  0x10   : > { %s233_s11 = scalar_lea.vmem %s779_s0, %s509_s7  ;;  %s723_s14 = scalar_lea.vmem %s784_s5, %s510_s8 }
  0x11   : > { %243 = vst [vmem:[%s723_s14] sm:$0x3] %v651_v1  ;;  %v244_v11 = vld [vmem:[%s233_s11] sm:$0xff] }
  0x12   : > { %539 = vmatmul.mubr.msk.f32.vlgmr.msra.gmra.mrb[0].mxu0 %vm253_vm2, %v244_v11  ;;  %584 = vmatpush3.bf16.msra.mxu1 %v583_v12 }
  0x13   : > { %585 = vmatprep.subr.bf16.mxu1 %v653_v5 }
  0x16   : > { %587 = vmatpush3.bf16.msra.mxu1 %v586_v15 }
  0x17   : > { %588 = vmatprep.subr.bf16.mxu1 %v653_v5 }
  0x18   : > { %v438_v48 = vld [vmem:[%s723_s14] sm:$0x3] }
  0x1a   : > { %590 = vmatpush3.bf16.msra.mxu1 %v589_v18 }
  0x1b   : > { %591 = vmatprep.subr.bf16.mxu1 %v653_v5 }
  0x1e   : > { %593 = vmatpush3.bf16.msra.mxu1 %v592_v21 }
  0x1f   : > { %594 = vmatprep.subr.bf16.mxu1 %v653_v5 }
  0x22   : > { %596 = vmatpush3.bf16.msra.mxu1 %v595_v24 }
  0x23   : > { %597 = vmatprep.subr.bf16.mxu1 %v653_v5 }
  0x26   : > { %599 = vmatpush3.bf16.msra.mxu1 %v598_v27 }
  0xe5   : > { %v327_v29 = vpop.f32.mrb[0].mxu0 }
  0xe6   : > { %v328_v30 = vadd.f32 %v511_v28, %v327_v29  ;;  %v540_v31 = vpop.f32.mrb[1].mxu0 }
  0xe8   : > { %v331_v32 = vmax.f32 %v328_v30, 0.0 }
  0xea   : > { %574 = vmatmul.mubr.f32.vlgmr.msra.gmra.mrb[0].mxu1 %v331_v32 }
 0x1bd   : > { %v421_v34 = vpop.f32.mrb[0].mxu1 }
 0x1be   : > { %v422_v35 = vadd.f32 %v514_v33, %v421_v34  ;;  %v575_v36 = vpop.f32.mrb[1].mxu1 }
 0x1c0   : > { %v425_v37 = vrot.slane %v422_v35, 4  ;;  %v431_v38 = vmul.f32 %v422_v35, %v422_v35 }
 0x1c2   : > { %v426_v39 = vadd.f32 %v425_v37, %v422_v35  ;;  %v432_v40 = vrot.slane %v431_v38, 4 }
 0x1c4   : > { %v427_v41 = vrot.slane %v426_v39, 2  ;;  %v433_v42 = vadd.f32 %v432_v40, %v431_v38 }
 0x1c6   : > { %v428_v43 = vadd.f32 %v427_v41, %v426_v39  ;;  %v434_v44 = vrot.slane %v433_v42, 2 }
 0x1c8   : > { %v429_v45 = vrot.slane %v428_v43, 1  ;;  %v435_v46 = vadd.f32 %v434_v44, %v433_v42 }
 0x1ca   : > { %v436_v47 = vrot.slane %v435_v46, 1  ;;  %v430_v49 = vadd.f32 %v429_v45, %v428_v43 }
 0x1cc   : > { %v437_v50 = vadd.f32 %v436_v47, %v435_v46 }
 0x1ce   : > { %v440_v51 = vsel %vm439_vm3, %v430_v49, %v437_v50 }
 0x1cf   : > { %v441_v52 = vadd.f32 %v440_v51, %v438_v48 }
 0x1d1   : > { %442 = vst [vmem:[%s723_s14] sm:$0x3] %v441_v52 }
 0x1d2 PF: > { %s15_s20 = sadd.s32 1, %s649_s20   ;;  %s785_s18 = smov %s645_s19 }
 0x1d3   : > { %p12_p5 = scmp.ge.s32.totalorder %s15_s20, 4   ;;  %s786_s19 = smov %s788_s21 }
 0x1d5   :  { %14 = sbr.rel (!%p12_p5) target bundleno = 2 (0x2), region = 74 }

</bundles_post_ra>
